<compile_context>
chip_gen: v6e
topology: v6e:2x2x1
jax: 0.10.0
libtpu: 0.0.40
codegen_flags: <defaults>
</compile_context>

<pallas_src>
import numpy as np
import jax
import jax.numpy as jnp
from jax.experimental import pallas as pl
from jax.experimental.pallas import tpu as pltpu


def _gabor_complex_kernel(x_ref, g_ref, w_ref, ob_ref, out_ref):
    """Grid = (n_tiles [parallel stimulus tiles], u_tiles [arbitrary reduction])."""
    u = pl.program_id(1)

    @pl.when(u == 0)
    def _init():
        out_ref[...] = jnp.zeros_like(out_ref)

    # (R_tile, S2) x (S2, N_TILE) -> (R_tile, N_TILE) projections on the MXU.
    proj = jnp.dot(g_ref[...], x_ref[...], preferred_element_type=jnp.float32)
    sq = proj * proj
    # Fused output_a scale + (phase, unit) reduction as a second small matmul,
    # accumulated into the resident (B_pad, N_TILE) output block.
    out_ref[...] = out_ref[...] + jnp.dot(
        w_ref[...], sq, preferred_element_type=jnp.float32)

    @pl.when(u == pl.num_programs(1) - 1)
    def _add_bias():
        out_ref[...] = out_ref[...] + ob_ref[...]      # (B_pad,1) broadcast over lanes


def _round_up(x, m):
    return ((x + m - 1) // m) * m


def gabor_complex_cell_forward(x_nchw, loc, sigma, orientation, frequency,
                               output_a, output_b, imsize, *,
                               n_tile=1024, dot_dtype=jnp.float32):
    f32 = jnp.float32
    S = imsize
    S2 = S * S
    B, U = orientation.shape
    n_img = x_nchw.shape[0]

    # ---- precompute the Gabor filter bank once (rows ordered (phase, b, u)) --
    # Base grid matches torch: linspace(-S/2+0.5, S/2-0.5, S)/S ; y negated.
    g1d = (jnp.arange(S, dtype=f32) - (S - 1) * 0.5) / S
    gx = g1d                      # _basegrid_x  (image column axis)
    gy = -g1d                     # _basegrid_y  (image row axis)
    xp = gx[None, None, :] - loc[0].astype(f32)[:, :, None]          # (B,U,S)
    yp = gy[None, None, :] - loc[1].astype(f32)[:, :, None]          # (B,U,S)
    cos_o = jnp.cos(orientation.astype(f32))[:, :, None, None]
    sin_o = jnp.sin(orientation.astype(f32))[:, :, None, None]
    ype = yp[:, :, :, None]       # row axis of the (S,S) image
    xpe = xp[:, :, None, :]       # column axis of the (S,S) image
    pat_y = ype * cos_o - xpe * sin_o                                 # (B,U,S,S)
    pat_x = ype * sin_o + xpe * cos_o
    xw = pat_x / sigma[0].astype(f32)[:, :, None, None]
    yh = pat_y / sigma[1].astype(f32)[:, :, None, None]
    env = jnp.exp(-0.5 * (xw * xw + yh * yh))
    arg = (2.0 * np.pi) * frequency.astype(f32)[:, :, None, None] * pat_y
    bank = jnp.stack([env * 0.5 * jnp.cos(arg),          # phase 0
                      env * 0.5 * (-jnp.sin(arg))],       # phase pi/2
                     axis=0).reshape(2 * B * U, S2)        # (R_raw, S2)
    R_raw = 2 * B * U

    # ---- R tiling: MXU-aligned with plain zero-row padding --------------------
    if R_raw <= 512:
        u_tiles = 1
        R_tile = _round_up(R_raw, 8)
    else:
        R_tile = 256                                   # MXU-aligned, %128 for W block
        u_tiles = -(-R_raw // R_tile)
    R_total = u_tiles * R_tile
    if R_total > R_raw:
        bank = jnp.concatenate(
            [bank, jnp.zeros((R_total - R_raw, S2), f32)], axis=0)

    # ---- reduction weights (B_pad, R_total) and bias (padded to 8 sublanes) --
    B_pad = max(8, _round_up(B, 8))
    oa = output_a.astype(f32)
    w = jnp.broadcast_to(
        jnp.eye(B, dtype=f32)[:, None, :, None] * oa[None, None, :, :],
        (B, 2, B, U)).reshape(B, R_raw)
    w_mat = jnp.zeros((B_pad, R_total), f32).at[:B, :R_raw].set(w)
    ob_col = jnp.zeros((B_pad, 1), f32).at[:B, 0].set(output_b.astype(f32))

    # ---- stimuli: flatten, transpose, lane-dense pad --------------------------
    x_t = x_nchw.reshape(n_img, S2).astype(f32).T                     # (S2, n_img)
    N_TILE = min(_round_up(n_img, 128), _round_up(n_tile, 128))
    # v7x megacore: make sure the parallel axis has >=2 tiles for real workloads.
    if n_img > 256 and _round_up(n_img, N_TILE) // N_TILE < 2:
        N_TILE = max(128, _round_up((n_img + 1) // 2, 128))

    dot_bytes = np.dtype(dot_dtype).itemsize

    def vmem_est(nt):
        return (2 * (S2 * nt * dot_bytes          # x tile (double buffered)
                     + R_tile * S2 * dot_bytes    # bank tile
                     + B_pad * R_tile * 4         # weight tile
                     + B_pad * 4                  # bias
                     + B_pad * nt * 4)            # resident output block
                + 2 * R_tile * nt * 4)            # proj / sq temporaries

    VMEM_BUDGET = 24 << 20                        # safe on v5e/v6e/v7x
    while N_TILE > 128 and vmem_est(N_TILE) > VMEM_BUDGET:
        N_TILE -= 128
    N_pad = _round_up(n_img, N_TILE)
    n_tiles = N_pad // N_TILE
    if N_pad > n_img:
        x_t = jnp.concatenate([x_t, jnp.zeros((S2, N_pad - n_img), f32)], axis=1)

    if dot_dtype != jnp.float32:                  # optional bf16 MXU path (v6e/v7x)
        x_t = x_t.astype(dot_dtype)
        bank = bank.astype(dot_dtype)

    vmem_limit = int(max(32 << 20, min(60 << 20, vmem_est(N_TILE) * 2 + (4 << 20))))

    # TODO(synk): on v5e consider pipeline_mode=pl.Buffered(3) on the bank spec
    # if its per-u DMA is exposed at the lower HBM bandwidth.
    out = pl.pallas_call(
        _gabor_complex_kernel,
        out_shape=jax.ShapeDtypeStruct((B_pad, N_pad), f32),
        grid=(n_tiles, u_tiles),
        in_specs=[
            pl.BlockSpec((S2, N_TILE), lambda n, u: (0, n)),      # stimulus tile
            pl.BlockSpec((R_tile, S2), lambda n, u: (u, 0)),      # filter bank tile
            pl.BlockSpec((B_pad, R_tile), lambda n, u: (0, u)),   # reduce weights
            pl.BlockSpec((B_pad, 1), lambda n, u: (0, 0)),        # output_b column
        ],
        out_specs=pl.BlockSpec((B_pad, N_TILE), lambda n, u: (0, n)),
        compiler_params=pltpu.CompilerParams(
            dimension_semantics=("parallel", "arbitrary"),
            vmem_limit_bytes=vmem_limit),
    )(x_t, bank, w_mat, ob_col)
    return out[:B, :n_img]


def reference_forward(x_nchw, loc, sigma, orientation, frequency,
                      output_a, output_b, imsize):
    """Pure-JAX transcription of the torch forward (for verification)."""
    S = imsize
    S2 = S * S
    B, U = orientation.shape
    n = x_nchw.shape[0]
    x_flat = x_nchw.reshape(n, S2)

    g = (jnp.arange(S, dtype=jnp.float32) - (S - 1) / 2.0) / S
    gx, gy = g, -g
    xp = gx[None, None, :] - loc[0][:, :, None]          # (B,U,S)
    yp = gy[None, None, :] - loc[1][:, :, None]          # (B,U,S)
    cos_o = jnp.cos(orientation)[:, :, None, None]
    sin_o = jnp.sin(orientation)[:, :, None, None]
    ype = yp[:, :, :, None]                              # (B,U,S,1)
    xpe = xp[:, :, None, :]                              # (B,U,1,S)
    pat_y = ype * cos_o - xpe * sin_o
    pat_x = ype * sin_o + xpe * cos_o
    xw = pat_x / sigma[0][:, :, None, None]
    yh = pat_y / sigma[1][:, :, None, None]
    env = jnp.exp(-0.5 * xw * xw - 0.5 * yh * yh)

    def gab(phase):
        return env * 0.5 * jnp.cos(
            2.0 * np.pi * frequency[:, :, None, None] * pat_y + phase)

    g1 = gab(0.0).reshape(B, U, S2)
    g2 = gab(np.pi / 2.0).reshape(B, U, S2)
    o1 = jnp.einsum('nk,buk->bun', x_flat, g1)
    o2 = jnp.einsum('nk,buk->bun', x_flat, g2)
    out = ((o1 ** 2 + o2 ** 2) * output_a[:, :, None]).sum(axis=1)
    return out + output_b[:, None]


if __name__ == "__main__":
    imsize = 16
    B, U, N = 2, 8, 8                 # batch_size (fits), num_unit, n stimuli

    key = jax.random.PRNGKey(0)
    k_loc, k_freq, k_ori, k_sig, k_x = jax.random.split(key, 5)

    # Deterministic parameter init mirroring GaborBase.__default_init shapes/ranges.
    actual_portion = 30.0 / (imsize / 0.5)
    loc = jax.random.uniform(k_loc, (2, B, U), jnp.float32) * actual_portion - actual_portion / 2
    frequency = jax.random.uniform(k_freq, (B, U), jnp.float32) * 6.0 + 2.0
    orientation = jax.random.uniform(k_ori, (B, U), jnp.float32) * np.pi
    s_lo, s_hi = 2.0 / imsize, 4.0 / imsize
    sigma = jax.random.uniform(k_sig, (2, B, U), jnp.float32) * (s_hi - s_lo) + s_lo
    output_a = jnp.ones((B, U), jnp.float32)
    output_b = jnp.zeros((B,), jnp.float32)

    # NCHW stimuli, single channel (forward flattens to imsize*imsize).
    x = jax.random.normal(k_x, (N, 1, imsize, imsize), jnp.float32)

    out = gabor_complex_cell_forward(x, loc, sigma, orientation, frequency,
                                     output_a, output_b, imsize)
    out = jax.block_until_ready(out)
    assert out.shape == (B, N)

    ref = jax.block_until_ready(
        reference_forward(x, loc, sigma, orientation, frequency,
                          output_a, output_b, imsize))
    # Tolerance covers the difference between the Mosaic f32 MXU-emulation path
    # and XLA's default-precision einsum; structural bugs would be O(1) off.
    if not np.allclose(np.asarray(out), np.asarray(ref), rtol=2e-2, atol=2e-2):
        raise AssertionError(
            f"mismatch: max abs diff {np.max(np.abs(np.asarray(out) - np.asarray(ref)))}")

    print("KERNEL_OK")
</pallas_src>

<mosaic_0001>
module attributes {stable_mosaic.version = 11 : i64} {
  func.func @_gabor_complex_kernel(%arg0: i32, %arg1: i32, %arg2: memref<256x128xf32, #tpu.memory_space<vmem>>, %arg3: memref<32x256xf32, #tpu.memory_space<vmem>>, %arg4: memref<8x32xf32, #tpu.memory_space<vmem>>, %arg5: memref<8x1xf32, #tpu.memory_space<vmem>>, %arg6: memref<8x128xf32, #tpu.memory_space<vmem>>) attributes {dimension_semantics = [#tpu.dimension_semantics<parallel>, #tpu.dimension_semantics<arbitrary>], iteration_bounds = array<i64: 1, 1>, scalar_prefetch = 0 : i64, scratch_operands = 0 : i64, tpu.core_type = #tpu.core_type<tc>, window_params = [{transform_indices = @transform_0, window_bounds = array<i64: 256, 128>}, {transform_indices = @transform_1, window_bounds = array<i64: 32, 256>}, {transform_indices = @transform_2, window_bounds = array<i64: 8, 32>}, {pipeline_mode = #tpu.pipeline_mode<synchronous>, transform_indices = @transform_3, window_bounds = array<i64: 8, 1>}, {transform_indices = @transform_4, window_bounds = array<i64: 8, 128>}]} {
    %c0_i32 = arith.constant 0 : i32
    %0 = arith.cmpi eq, %arg1, %c0_i32 : i32
    %1 = arith.extui %0 : i1 to i32
    %c0_i32_0 = arith.constant 0 : i32
    %2 = arith.cmpi ne, %1, %c0_i32_0 : i32
    scf.if %2 {
      %cst_13 = arith.constant 0.000000e+00 : f32
      %15 = vector.broadcast %cst_13 : f32 to vector<8x128xf32>
      %c0_14 = arith.constant 0 : index
      %c0_15 = arith.constant 0 : index
      %16 = vector.load %arg6[%c0_14, %c0_15] : memref<8x128xf32, #tpu.memory_space<vmem>>, vector<8x128xf32>
      tpu.vector_store %arg6[%c0_14, %c0_15], %15 {strides = array<i32>} : memref<8x128xf32, #tpu.memory_space<vmem>>, vector<8x128xf32>,
    } else {
    }
    %c0 = arith.constant 0 : index
    %c0_1 = arith.constant 0 : index
    %3 = vector.load %arg3[%c0, %c0_1] : memref<32x256xf32, #tpu.memory_space<vmem>>, vector<32x256xf32>
    %c0_2 = arith.constant 0 : index
    %c0_3 = arith.constant 0 : index
    %4 = vector.load %arg2[%c0_2, %c0_3] : memref<256x128xf32, #tpu.memory_space<vmem>>, vector<256x128xf32>
    %cst = arith.constant dense<0.000000e+00> : vector<32x128xf32>
    %5 = tpu.matmul %3, %4, %cst {dimension_numbers = #tpu.dot_dimension_numbers<[1], [0], [0], [1], [0, 0, 1, 1], [], []>} : vector<32x256xf32>, vector<256x128xf32>, vector<32x128xf32> -> vector<32x128xf32>
    %6 = arith.mulf %5, %5 : vector<32x128xf32>
    %c0_4 = arith.constant 0 : index
    %c0_5 = arith.constant 0 : index
    %7 = vector.load %arg6[%c0_4, %c0_5] : memref<8x128xf32, #tpu.memory_space<vmem>>, vector<8x128xf32>
    %c0_6 = arith.constant 0 : index
    %c0_7 = arith.constant 0 : index
    %8 = vector.load %arg4[%c0_6, %c0_7] : memref<8x32xf32, #tpu.memory_space<vmem>>, vector<8x32xf32>
    %cst_8 = arith.constant dense<0.000000e+00> : vector<8x128xf32>
    %9 = tpu.matmul %8, %6, %cst_8 {dimension_numbers = #tpu.dot_dimension_numbers<[1], [0], [0], [1], [0, 0, 1, 1], [], []>} : vector<8x32xf32>, vector<32x128xf32>, vector<8x128xf32> -> vector<8x128xf32>
    %10 = arith.addf %7, %9 : vector<8x128xf32>
    %c0_9 = arith.constant 0 : index
    %c0_10 = arith.constant 0 : index
    %11 = vector.load %arg6[%c0_9, %c0_10] : memref<8x128xf32, #tpu.memory_space<vmem>>, vector<8x128xf32>
    tpu.vector_store %arg6[%c0_9, %c0_10], %10 {strides = array<i32>} : memref<8x128xf32, #tpu.memory_space<vmem>>, vector<8x128xf32>,
    %c0_i32_11 = arith.constant 0 : i32
    %12 = arith.cmpi eq, %arg1, %c0_i32_11 : i32
    %13 = arith.extui %12 : i1 to i32
    %c0_i32_12 = arith.constant 0 : i32
    %14 = arith.cmpi ne, %13, %c0_i32_12 : i32
    scf.if %14 {
      %c0_13 = arith.constant 0 : index
      %c0_14 = arith.constant 0 : index
      %15 = vector.load %arg6[%c0_13, %c0_14] : memref<8x128xf32, #tpu.memory_space<vmem>>, vector<8x128xf32>
      %c0_15 = arith.constant 0 : index
      %c0_16 = arith.constant 0 : index
      %16 = vector.load %arg5[%c0_15, %c0_16] : memref<8x1xf32, #tpu.memory_space<vmem>>, vector<8x1xf32>
      %17 = vector.broadcast %16 : vector<8x1xf32> to vector<8x128xf32>
      %18 = arith.addf %15, %17 : vector<8x128xf32>
      %c0_17 = arith.constant 0 : index
      %c0_18 = arith.constant 0 : index
      %19 = vector.load %arg6[%c0_17, %c0_18] : memref<8x128xf32, #tpu.memory_space<vmem>>, vector<8x128xf32>
      tpu.vector_store %arg6[%c0_17, %c0_18], %18 {strides = array<i32>} : memref<8x128xf32, #tpu.memory_space<vmem>>, vector<8x128xf32>,
    } else {
    }
    return
  }
  func.func @transform_0(%arg0: i32, %arg1: i32) -> (i32, i32) {
    %c0_i32 = arith.constant 0 : i32
    %c0_i32_0 = arith.constant 0 : i32
    return %c0_i32, %arg0 : i32, i32
  }
  func.func @transform_1(%arg0: i32, %arg1: i32) -> (i32, i32) {
    %c0_i32 = arith.constant 0 : i32
    %c0_i32_0 = arith.constant 0 : i32
    return %arg1, %c0_i32 : i32, i32
  }
  func.func @transform_2(%arg0: i32, %arg1: i32) -> (i32, i32) {
    %c0_i32 = arith.constant 0 : i32
    %c0_i32_0 = arith.constant 0 : i32
    return %c0_i32, %arg1 : i32, i32
  }
  func.func @transform_3(%arg0: i32, %arg1: i32) -> (i32, i32) {
    %c0_i32 = arith.constant 0 : i32
    %c0_i32_0 = arith.constant 0 : i32
    %c0_i32_1 = arith.constant 0 : i32
    return %c0_i32, %c0_i32_0 : i32, i32
  }
  func.func @transform_4(%arg0: i32, %arg1: i32) -> (i32, i32) {
    %c0_i32 = arith.constant 0 : i32
    %c0_i32_0 = arith.constant 0 : i32
    return %c0_i32, %arg0 : i32, i32
  }
}

</mosaic_0001>

<bundles_post_ra>
// kernel: tpu_custom_call.1
= control target key start
LH: loop header
LB: loop body
LE: loop exit
PB: predicated region body
PF: predicated region fallthrough
CT: control target
= control target key end

     0   :  { %9 = vsyncpa [#allocation3], 0  ;;  %s474_s0 = inlined_call_operand.hbm [shape: f32[256,128], index: 0, kind: input, shape index: {}]   ;;  %s475_s1 = inlined_call_operand.hbm [shape: f32[32,256], index: 1, kind: input, shape index: {}]   ;;  %s476_s2 = inlined_call_operand.vmem [shape: f32[8,32], index: 2, kind: input, shape index: {}]   ;;  %s477_s3 = inlined_call_operand.vmem [shape: f32[8,1], index: 3, kind: input, shape index: {}]   ;;  %s478_s4 = inlined_call_operand.hbm [shape: f32[8,128], index: 4, kind: output, shape index: {}]  }
   0x1   :  { %10 = vsyncpa [#allocation6], 0 }
   0x2   :  { %11 = vsyncpa [#allocation4], 0  ;;  %s424_s15 = smov [#allocation2]  }
   0x3   :  { %s17_s16 = sshll.u32 %s424_s15, 4  ;;  %s18_s16 = int_to_ptr.vmem [resolvable:$true] %s17_s16 }
   0x4   :  { %s366_s17 = scalar_lea.vmem %s18_s16, 4096  ;;  %p371_p1 = scmp.lt.s32.totalorder %s18_s16, %s18_s16 }
   0x5   :  { %p367_p0 = scmp.ne.s32.totalorder %s18_s16, %s366_s17  ;;  %p372_p2 = scmp.lt.s32.totalorder %s366_s17, %s366_s17 }
   0x7   :  { %p373_p3 = por %p372_p2, %p371_p1 }
   0x9   :  { %p374_p4 = pnand %p373_p3, %p367_p0 }
   0xb   :  { %377 = shalt.err (!%p374_p4)
}
   0xc   :  { %s425_s18 = smov 128   ;;  %s426_s19 = smov 8  }
   0xd   :  { %23 = dma.hbm_to_vmem [thread:$0]  %s474_s0, 4096, %s18_s16, [#allocation3], %s425_s18, %s425_s18, %s426_s19  }
   0xe   :  { %s427_s22 = smov [#allocation5]  }
   0xf   :  { %s29_s23 = sshll.u32 %s427_s22, 4  ;;  %s30_s23 = int_to_ptr.vmem [resolvable:$true] %s29_s23 }
  0x10   :  { %s386_s24 = scalar_lea.vmem %s30_s23, 1024  ;;  %p391_p6 = scmp.lt.s32.totalorder %s30_s23, %s30_s23 }
  0x11   :  { %p387_p5 = scmp.ne.s32.totalorder %s30_s23, %s386_s24  ;;  %p392_p7 = scmp.lt.s32.totalorder %s386_s24, %s386_s24 }
  0x13   :  { %p393_p8 = por %p392_p7, %p391_p6 }
  0x15   :  { %p394_p9 = pnand %p393_p8, %p387_p5 }
  0x17   :  { %397 = shalt.err (!%p394_p9)
}
  0x18   :  { %s428_s25 = smov 256   ;;  %s429_s26 = smov 16  }
  0x19   :  { %35 = dma.hbm_to_vmem [thread:$0]  %s475_s1, 1024, %s30_s23, [#allocation6], %s428_s25, %s428_s25, %s429_s26  }
  0x1a   :  { %418 = dma.done.wait [#allocation3], 4096  }
  0x1b   :  { %419 = vsyncadd [#allocation3], 4294963200 }
  0x1c   :  { %420 = dma.done.wait [#allocation6], 1024  }
  0x1d   :  { %421 = vsyncadd [#allocation6], 4294966272  ;;  %v90_v0 = vld [vmem:[#allocation2 + $0xf8] sm:$0xff]  ;;  %v89_v2 = vld [vmem:[#allocation2 + $0xf0] sm:$0xff]  ;;  %v430_v40 = vmov 0.0   ;;  %vm431_vm0 = vmmov 0  }
  0x1e   :  { %v74_v1 = vld [vmem:[#allocation2 + $0x78] sm:$0xff]  ;;  %287 = vmatprep.subr.mxu0 %v90_v0  ;;  %v73_v3 = vld [vmem:[#allocation2 + $0x70] sm:$0xff]  ;;  %v88_v4 = vld [vmem:[#allocation2 + $0xe8] sm:$0xff]  ;;  %336 = vmatprep.subr.mxu1 %v430_v40  ;;  %v432_v42 = vmov 0   ;;  %vm182_vm1 = vcmask 261120   ;;  %s433_s30 = smov [#allocation7]  }
  0x1f   :  { %288 = vmatpush3.msra.mxu0 %v74_v1  ;;  %v72_v5 = vld [vmem:[#allocation2 + $0x68] sm:$0xff]  ;;  %v87_v6 = vld [vmem:[#allocation2 + $0xe0] sm:$0xff]  ;;  %v86_v8 = vld [vmem:[#allocation2 + $0xd8] sm:$0xff]  ;;  %344 = vmatprep.mubr.msk.f32.mxu1 %vm431_vm0, %v430_v40  ;;  %s276_s5 = sshll.u32 %s433_s30, 4  ;;  %s277_s5 = int_to_ptr.vmem [resolvable:$true] %s276_s5 }
  0x20   :  { %289 = vmatprep.subr.mxu0 %v89_v2  ;;  %v71_v7 = vld [vmem:[#allocation2 + $0x60] sm:$0xff]  ;;  %v70_v9 = vld [vmem:[#allocation2 + $0x58] sm:$0xff]  ;;  %v85_v10 = vld [vmem:[#allocation2 + $0xd0] sm:$0xff]  ;;  %357 = vset.pattern.permute.xlu0 %v432_v42  ;;  %s398_s6 = scalar_lea.vmem %s277_s5, 128  ;;  %p403_p11 = scmp.lt.s32.totalorder %s277_s5, %s277_s5 }
  0x21   :  { %290 = vmatpush3.msra.mxu0 %v73_v3  ;;  %v69_v11 = vld [vmem:[#allocation2 + $0x50] sm:$0xff]  ;;  %v84_v12 = vld [vmem:[#allocation2 + $0xc8] sm:$0xff]  ;;  %v83_v15 = vld [vmem:[#allocation2 + $0xc0] sm:$0xff]  ;;  %p399_p10 = scmp.ne.s32.totalorder %s277_s5, %s398_s6  ;;  %p404_p12 = scmp.lt.s32.totalorder %s398_s6, %s398_s6 }
  0x22   :  { %291 = vmatprep.subr.mxu0 %v88_v4  ;;  %v52_v13 = vld [vmem:[#allocation5 + $0x8] sm:$0xff]  ;;  %v67_v16 = vld [vmem:[#allocation2 + $0x40] sm:$0xff]  ;;  %v82_v17 = vld [vmem:[#allocation2 + $0xb8] sm:$0xff] }
  0x23   :  { %292 = vmatpush3.msra.mxu0 %v72_v5  ;;  %v68_v14 = vld [vmem:[#allocation2 + $0x48] sm:$0xff]  ;;  %155 = vmatprep.mubr.f32.mxu0 %v52_v13  ;;  %v66_v18 = vld [vmem:[#allocation2 + $0x38] sm:$0xff]  ;;  %v81_v19 = vld [vmem:[#allocation2 + $0xb0] sm:$0xff]  ;;  %p405_p13 = por %p404_p12, %p403_p11 }
  0x24   :  { %293 = vmatprep.subr.mxu0 %v87_v6  ;;  %v65_v20 = vld [vmem:[#allocation2 + $0x30] sm:$0xff]  ;;  %v80_v21 = vld [vmem:[#allocation2 + $0xa8] sm:$0xff]  ;;  %v79_v23 = vld [vmem:[#allocation2 + $0xa0] sm:$0xff] }
  0x25   :  { %294 = vmatpush3.msra.mxu0 %v71_v7  ;;  %v64_v22 = vld [vmem:[#allocation2 + $0x28] sm:$0xff]  ;;  %v63_v24 = vld [vmem:[#allocation2 + $0x20] sm:$0xff]  ;;  %v78_v25 = vld [vmem:[#allocation2 + $0x98] sm:$0xff]  ;;  %p406_p0 = pnand %p405_p13, %p399_p10 }
  0x26   :  { %295 = vmatprep.subr.mxu0 %v86_v8  ;;  %v62_v26 = vld [vmem:[#allocation2 + $0x18] sm:$0xff]  ;;  %v77_v27 = vld [vmem:[#allocation2 + $0x90] sm:$0xff]  ;;  %v76_v29 = vld [vmem:[#allocation2 + $0x88] sm:$0xff] }
  0x27   :  { %296 = vmatpush3.msra.mxu0 %v70_v9  ;;  %v61_v28 = vld [vmem:[#allocation2 + $0x10] sm:$0xff]  ;;  %v60_v30 = vld [vmem:[#allocation2 + $0x8] sm:$0xff]  ;;  %v75_v31 = vld [vmem:[#allocation2 + $0x80] sm:$0xff] }
  0x28   :  { %297 = vmatprep.subr.mxu0 %v85_v10  ;;  %v59_v32 = vld [vmem:[#allocation2] sm:$0xff]  ;;  %v54_v34 = vld [vmem:[#allocation5 + $0x18] sm:$0xff]  ;;  %v53_v35 = vld [vmem:[#allocation5 + $0x10] sm:$0xff] }
  0x29   :  { %298 = vmatpush3.msra.mxu0 %v69_v11  ;;  %v51_v33 = vld [vmem:[#allocation5] sm:$0xff]  ;;  %v56_v36 = vld [vmem:[#allocation5 + $0x28] sm:$0xff]  ;;  %v58_v38 = vld [vmem:[#allocation5 + $0x38] sm:$0xff] }
  0x2a   :  { %299 = vmatprep.subr.mxu0 %v84_v12  ;;  %v55_v37 = vld [vmem:[#allocation5 + $0x20] sm:$0xff]  ;;  %v57_v39 = vld [vmem:[#allocation5 + $0x30] sm:$0xff] }
  0x2b   :  { %300 = vmatpush3.msra.mxu0 %v68_v14  ;;  %v262_v41 = vld [vmem:[%s477_s3] sm:$0xff] }
  0x2c   :  { %301 = vmatprep.subr.mxu0 %v83_v15  ;;  %265 = vperm.xlu0 %357, %v262_v41   ;;  %v181_v59 = vld [vmem:[%s476_s2] sm:$0xff] }
  0x2d   :  { %302 = vmatpush3.msra.mxu0 %v67_v16 }
  0x2e   :  { %303 = vmatprep.subr.mxu0 %v82_v17 }
  0x2f   :  { %304 = vmatpush3.msra.mxu0 %v66_v18 }
  0x30   :  { %305 = vmatprep.subr.mxu0 %v81_v19 }
  0x31   :  { %306 = vmatpush3.msra.mxu0 %v65_v20 }
  0x32   :  { %307 = vmatprep.subr.mxu0 %v80_v21 }
  0x33   :  { %308 = vmatpush3.msra.mxu0 %v64_v22 }
  0x34   :  { %309 = vmatprep.subr.mxu0 %v79_v23 }
  0x35   :  { %310 = vmatpush3.msra.mxu0 %v63_v24 }
  0x36   :  { %311 = vmatprep.subr.mxu0 %v78_v25 }
  0x37   :  { %312 = vmatpush3.msra.mxu0 %v62_v26 }
  0x38   :  { %313 = vmatprep.subr.mxu0 %v77_v27 }
  0x39   :  { %314 = vmatpush3.msra.mxu0 %v61_v28 }
  0x3a   :  { %315 = vmatprep.subr.mxu0 %v76_v29 }
  0x3b   :  { %316 = vmatpush3.msra.mxu0 %v60_v30 }
  0x3c   :  { %317 = vmatprep.subr.mxu0 %v75_v31 }
  0x3d   :  { %318 = vmatpush3.msra.mxu0 %v59_v32 }
  0x3e   :  { %156 = vmatmul.mubr.f32.vlgmr.msra.gmra.mxu0 %v51_v33 }
  0x3f   :  { %160 = vmatprep.mubr.f32.mxu0 %v54_v34 }
  0x42   :  { %161 = vmatmul.mubr.f32.gmra.mxu0 %v53_v35 }
  0x43   :  { %165 = vmatprep.mubr.f32.mxu0 %v56_v36 }
  0x46   :  { %166 = vmatmul.mubr.f32.gmra.mxu0 %v55_v37 }
  0x47   :  { %170 = vmatprep.mubr.f32.mxu0 %v58_v38 }
  0x4a   :  { %171 = vmatmul.mubr.f32.gmra.mxu0 %v57_v39 }
  0xa7   :  { %v266_v61 = vpop.permute.xlu0 %265 }
  0xfe   :  { %v319_v43 = vpop.f32.mrf.mxu0 }
 0x100   :  { %v320_v44 = vpop.f32.mrf.mxu0 }
 0x101   :  { %v321_v55 = vadd.f32 %v320_v44, %v319_v43 }
 0x102   :  { %v322_v45 = vpop.f32.mrf.mxu0 }
 0x103   :  { %v176_v58 = vmul.f32 %v321_v55, %v321_v55 }
 0x104   :  { %v323_v46 = vpop.f32.mrf.mxu0 }
 0x105   :  { %v324_v53 = vadd.f32 %v323_v46, %v322_v45 }
 0x106   :  { %v325_v47 = vpop.f32.mrf.mxu0 }
 0x107   :  { %v177_v57 = vmul.f32 %v324_v53, %v324_v53 }
 0x108   :  { %v326_v48 = vpop.f32.mrf.mxu0 }
 0x109   :  { %v327_v51 = vadd.f32 %v326_v48, %v325_v47 }
 0x10a   :  { %v328_v49 = vpop.f32.mrf.mxu0 }
 0x10b   :  { %v178_v56 = vmul.f32 %v327_v51, %v327_v51 }
 0x10c   :  { %v329_v50 = vpop.f32.mrf.mxu0 }
 0x10d   :  { %v330_v52 = vadd.f32 %v329_v50, %v328_v49 }
 0x10f   :  { %v179_v54 = vmul.f32 %v330_v52, %v330_v52 }
 0x111   :  { %337 = vmatpush3.msra.mxu1 %v179_v54 }
 0x112   :  { %338 = vmatprep.subr.mxu1 %v430_v40 }
 0x113   :  { %339 = vmatpush3.msra.mxu1 %v178_v56 }
 0x114   :  { %340 = vmatprep.subr.mxu1 %v430_v40 }
 0x115   :  { %341 = vmatpush3.msra.mxu1 %v177_v57 }
 0x116   :  { %342 = vmatprep.subr.mxu1 %v430_v40 }
 0x117   :  { %343 = vmatpush3.msra.mxu1 %v176_v58 }
 0x118   :  { %345 = vmatmul.mubr.msk.f32.vlgmr.msra.gmra.mxu1 %vm182_vm1, %v181_v59 }
 0x1d8   :  { %v252_v60 = vpop.f32.mrf.mxu1 }
 0x1d9   :  { %v268_v63 = vadd.f32 %v266_v61, %v252_v60 }
 0x1da   :  { %v346_v62 = vpop.f32.mrf.mxu1 }
 0x1db   :  { %269 = vst [vmem:[#allocation7] sm:$0xff] %v268_v63 }
 0x1dc   :  { %409 = shalt.err (!%p406_p0)
}
 0x1dd   :  { %279 = dma.vmem_to_hbm [thread:$0]  %s277_s5, 128, %s478_s4, [#allocation4]  }
 0x1de   :  { %422 = dma.done.wait [#allocation4], 128  }
 0x1df   :  { %423 = vsyncadd [#allocation4], 4294967168 }
 0x1e0   :  { %283 = vsyncpa [#allocation3], 1 }
 0x1e1   :  { %284 = vsyncpa [#allocation6], 1 }
 0x1e2   :  { %285 = vsyncpa [#allocation4], 1 }

</bundles_post_ra>
